<compile_context>
chip_gen: v6e
topology: v6e:2x2x1
jax: 0.10.0
libtpu: 0.0.40
codegen_flags: <defaults>
</compile_context>

<pallas_src>
import functools
import numpy as np
import jax
import jax.numpy as jnp
from jax.experimental import pallas as pl
from jax.experimental.pallas import tpu as pltpu


def _ceil_to(x, m):
    return ((x + m - 1) // m) * m


def _vmem_limit_bytes():
    # Generation-aware limit: leave headroom below physical VMEM
    # (64 MiB on v7x, 128 MiB on v5e/v6e).
    try:
        cap = int(pltpu.get_tpu_info().vmem_capacity_bytes)
    except Exception:
        cap = 64 * 1024 * 1024
    return int(min(cap * 3 // 4, 100 * 1024 * 1024))


# ----------------------------------------------------------------------------
# Fused Pallas kernel: whole MAFMOG forward in a single invocation (no grid)
# ----------------------------------------------------------------------------

def _mafmog_fused_kernel(*refs, n_blocks, n_layers, C, Lp, N_valid, eps):
    """refs layout (all activations are (features, batch) = (rows, lanes)):
         [x (Lp, Np)]
         + per MAF block: [W_0, b_0, ..., W_{nl-1}, b_{nl-1}, gamma, log_gamma, beta]
         + MoG head:      [W_0, b_0, ..., W_{nl-2}, b_{nl-2}] (shared trunk)
                          + per component c: [Wc (3*Lp, Hp), bc (3*Lp, 1)]
         + outputs:       [u (C*Lp, Np), sum_log_det (C*Lp, Np)]
       Weights are mask-folded and row-remapped in the wrapper so no mask multiply or
       relayout happens inside the kernel.
    """
    idx = 0
    x_ref = refs[idx]; idx += 1
    blocks = []
    for _ in range(n_blocks):
        layers = []
        for _ in range(n_layers):
            layers.append((refs[idx], refs[idx + 1])); idx += 2
        blocks.append((layers, refs[idx], refs[idx + 1], refs[idx + 2])); idx += 3
    head_hidden = []
    for _ in range(n_layers - 1):
        head_hidden.append((refs[idx], refs[idx + 1])); idx += 2
    head_out = []
    for _ in range(C):
        head_out.append((refs[idx], refs[idx + 1])); idx += 2
    u_ref, ld_ref = refs[idx], refs[idx + 1]

    h = x_ref[...]                                       # (Lp, Np) f32, stays in VMEM
    Np = h.shape[1]
    ld_sum = jnp.zeros((Lp, Np), jnp.float32)

    # (1, Np) lane-validity mask: batch is padded to a multiple of 128 lanes, and
    # BatchNorm statistics must only see the real N_valid columns.
    col_ids = jax.lax.broadcasted_iota(jnp.int32, (1, Np), 1)
    valid = (col_ids < N_valid).astype(jnp.float32)
    inv_n = 1.0 / N_valid
    inv_nm1 = 1.0 / (N_valid - 1)                        # torch.var(0) unbiased; N >= 2

    def masked_mlp(a, layers):
        W, b = layers[0]                                 # net_input: no activation before
        z = jnp.dot(W[...], a, preferred_element_type=jnp.float32) + b[...]
        for W, b in layers[1:]:                          # ReLU then (mask-folded) linear
            z = jnp.dot(W[...], jnp.maximum(z, 0.0),
                        preferred_element_type=jnp.float32) + b[...]
        return z

    # ---- MAF stack: n_blocks x (MADE -> RealNVP BatchNorm, training batch stats) ----
    for layers, gamma_ref, lg_ref, beta_ref in blocks:
        z = masked_mlp(h, layers)                        # (2*Lp, Np): rows [m | loga]
        m = z[:Lp, :]
        loga = z[Lp:2 * Lp, :]
        h = (h - m) * jnp.exp(-loga)
        ld_sum = ld_sum - loga

        # BatchNorm statistics are lane-reductions over the batch (XLU), per feature row.
        mean = jnp.sum(h * valid, axis=1, keepdims=True) * inv_n          # (Lp, 1)
        diff = (h - mean) * valid
        var = jnp.sum(diff * diff, axis=1, keepdims=True) * inv_nm1       # unbiased
        inv_std = jax.lax.rsqrt(var + eps)                                # EUP rsqrt
        h = gamma_ref[...] * ((h - mean) * inv_std) + beta_ref[...]       # gamma=exp(lg) prefolded
        ld_sum = ld_sum + (lg_ref[...] - 0.5 * jnp.log(var + eps))        # (Lp,1) broadcast-add

    # ---- MADEMOG head: shared trunk once, then one small matmul per mixture component ----
    a = masked_mlp(h, head_hidden)
    a = jnp.maximum(a, 0.0)
    for c, (Wc, bc) in enumerate(head_out):
        zc = jnp.dot(Wc[...], a, preferred_element_type=jnp.float32) + bc[...]   # (3*Lp, Np)
        m_c = zc[:Lp, :]
        loga_c = zc[Lp:2 * Lp, :]                        # rows [2*Lp:3*Lp] are logr (unused)
        u_ref[c * Lp:(c + 1) * Lp, :] = (h - m_c) * jnp.exp(-loga_c)
        ld_ref[c * Lp:(c + 1) * Lp, :] = ld_sum - loga_c


def mafmog_fused_forward(flat_params, x, *, n_blocks, n_layers, C, L, Lp):
    N = x.shape[0]
    if N < 2:
        raise ValueError("BatchNorm training path requires batch size >= 2 "
                         "(torch.var(0) divides by N-1).")
    Np = _ceil_to(N, 128)                                # batch lives on the 128-wide lane axis
    xp = jnp.zeros((Lp, Np), jnp.float32).at[:L, :N].set(x.astype(jnp.float32).T)

    kernel = functools.partial(
        _mafmog_fused_kernel, n_blocks=n_blocks, n_layers=n_layers,
        C=C, Lp=Lp, N_valid=N, eps=1e-5)

    inputs = (xp,) + tuple(flat_params)
    weight_flops = int(sum(2 * Np * int(p.shape[0]) * int(p.shape[1])
                           for p in flat_params if p.ndim == 2 and p.shape[1] > 1))
    bytes_accessed = int(4 * (sum(int(np.prod(p.shape)) for p in inputs) + 2 * C * Lp * Np))
    transcendentals = int(Np * Lp * (n_blocks + C) + 2 * n_blocks * Lp)

    u_pad, ld_pad = pl.pallas_call(
        kernel,
        out_shape=(jax.ShapeDtypeStruct((C * Lp, Np), jnp.float32),
                   jax.ShapeDtypeStruct((C * Lp, Np), jnp.float32)),
        in_specs=[pl.BlockSpec(memory_space=pltpu.MemorySpace.VMEM)] * len(inputs),
        out_specs=(pl.BlockSpec(memory_space=pltpu.MemorySpace.VMEM),
                   pl.BlockSpec(memory_space=pltpu.MemorySpace.VMEM)),
        compiler_params=pltpu.CompilerParams(vmem_limit_bytes=_vmem_limit_bytes()),
        cost_estimate=pl.CostEstimate(flops=weight_flops, transcendentals=transcendentals,
                                      bytes_accessed=bytes_accessed),
    )(*inputs)

    # Small post-kernel relayout back to the PyTorch (N, C, L) convention.
    u = jnp.transpose(u_pad.reshape(C, Lp, Np), (2, 0, 1))[:N, :, :L]
    ld = jnp.transpose(ld_pad.reshape(C, Lp, Np), (2, 0, 1))[:N, :, :L]
    return u, ld


# ----------------------------------------------------------------------------
# Pure-JAX reference (for correctness check; uses raw, unpadded parameters)
# ----------------------------------------------------------------------------

def mafmog_forward_ref(raw, x, *, C, L):
    N = x.shape[0]

    def made_net(a, layers):
        W, M, b = layers[0]
        z = a @ (W * M).T + b
        for W, M, b in layers[1:]:
            z = jnp.maximum(z, 0.0) @ (W * M).T + b
        return z

    h = x
    ld_sum = jnp.zeros((N, L), jnp.float32)
    for blk in raw['maf_blocks']:
        z = made_net(h, blk['layers'])
        m, loga = z[:, :L], z[:, L:2 * L]
        h = (h - m) * jnp.exp(-loga)
        ld_sum = ld_sum - loga
        mean = jnp.mean(h, axis=0, keepdims=True)
        var = jnp.sum((h - mean) ** 2, axis=0, keepdims=True) / (N - 1)
        x_hat = (h - mean) / jnp.sqrt(var + 1e-5)
        h = jnp.exp(blk['log_gamma']) * x_hat + blk['beta']
        ld_sum = ld_sum + (blk['log_gamma'] - 0.5 * jnp.log(var + 1e-5))
    z = made_net(h, raw['mog_layers']).reshape(N, C, 3 * L)
    m, loga = z[:, :, :L], z[:, :, L:2 * L]
    u = (h[:, None, :] - m) * jnp.exp(-loga)
    return u, ld_sum[:, None, :] - loga


# ----------------------------------------------------------------------------
# Parameter construction (deterministic, mirrors the PyTorch module structure)
# ----------------------------------------------------------------------------

def create_masks_np(input_size, hidden_size, n_hidden, input_degrees=None):
    degrees = [np.arange(input_size) if input_degrees is None else np.asarray(input_degrees)]
    for _ in range(n_hidden + 1):
        degrees.append(np.arange(hidden_size) % (input_size - 1))
    if input_degrees is None:
        degrees.append(np.arange(input_size) % input_size - 1)
    else:
        degrees.append(np.asarray(input_degrees) % input_size - 1)
    masks = [(d1[:, None] >= d0[None, :]).astype(np.float32)
             for d0, d1 in zip(degrees[:-1], degrees[1:])]
    return masks, degrees[0]


def init_linear(key, dout, din):
    kw, kb = jax.random.split(key)
    bound = 1.0 / np.sqrt(din)
    W = jax.random.uniform(kw, (dout, din), jnp.float32, -bound, bound)
    b = jax.random.uniform(kb, (dout,), jnp.float32, -bound, bound)
    return W, b


def build_made_layers(key, L, H, n_hidden, out_mult, input_degrees):
    masks, deg0 = create_masks_np(L, H, n_hidden, input_degrees)
    keys = jax.random.split(key, len(masks))
    layers = []
    W, b = init_linear(keys[0], H, L)                          # net_input
    layers.append((W, jnp.asarray(masks[0]), b))
    for i, m in enumerate(masks[1:-1]):                        # hidden masked linears
        W, b = init_linear(keys[1 + i], H, H)
        layers.append((W, jnp.asarray(m), b))
    W, b = init_linear(keys[-1], out_mult * L, H)              # output: mask.repeat(out_mult, 1)
    layers.append((W, jnp.asarray(np.tile(masks[-1], (out_mult, 1))), b))
    return layers, deg0


def build_raw_params(key, n_blocks, C, L, H, n_hidden):
    params = {'maf_blocks': [], 'mog_layers': None}
    input_degrees = None
    for _ in range(n_blocks):
        key, sub = jax.random.split(key)
        layers, deg0 = build_made_layers(sub, L, H, n_hidden, 2, input_degrees)
        input_degrees = deg0[::-1].copy()                      # .flip(0) between MAF blocks
        params['maf_blocks'].append({
            'layers': layers,
            'log_gamma': jnp.zeros((L,), jnp.float32),         # torch BatchNorm param init
            'beta': jnp.zeros((L,), jnp.float32),
        })
    key, sub = jax.random.split(key)
    mog_layers, _ = build_made_layers(sub, L, H, n_hidden, C * 3, input_degrees)
    params['mog_layers'] = mog_layers
    return params


# ----------------------------------------------------------------------------
# One-time preprocessing: fold masks, keep (Dout, Din), pad feature rows to sublane multiples
# ----------------------------------------------------------------------------

def _pad_masked_linear_T(W, mask, b, dout_pad, din_pad, row_map):
    Wm = (np.asarray(W) * np.asarray(mask)).astype(np.float32)   # fold static AR mask once
    Dout, Din = Wm.shape
    Wp = np.zeros((dout_pad, din_pad), np.float32)
    Wp[row_map, :Din] = Wm                                       # (Dout, Din) for z = W @ h
    bp = np.zeros((dout_pad, 1), np.float32)
    bp[row_map, 0] = np.asarray(b, np.float32)
    return jnp.asarray(Wp), jnp.asarray(bp)


def _chunk_row_map(dout, L, Lp):
    k = np.arange(dout)
    return (k // L) * Lp + (k % L)       # keep every L-wide chunk Lp-(sublane)-aligned


def _prepare_made_layers(layers, L, Lp, Hp):
    """MAF-block MADE: all layers; output rows remapped so [m | loga] chunks are Lp-aligned."""
    n = len(layers)
    flat = []
    for li, (W, M, b) in enumerate(layers):
        Dout = W.shape[0]
        din_pad = Lp if li == 0 else Hp
        if li == n - 1:
            row_map = _chunk_row_map(Dout, L, Lp)
            dout_pad = (Dout // L) * Lp
        else:
            row_map = np.arange(Dout)
            dout_pad = Hp
        flat.extend(_pad_masked_linear_T(W, M, b, dout_pad, din_pad, row_map))
    return flat


def _prepare_head_layers(layers, L, Lp, Hp, C):
    """MoG head: shared trunk layers + the output layer split into C per-component chunks."""
    flat = []
    for li, (W, M, b) in enumerate(layers[:-1]):
        din_pad = Lp if li == 0 else Hp
        flat.extend(_pad_masked_linear_T(W, M, b, Hp, din_pad, np.arange(W.shape[0])))
    W, M, b = layers[-1]
    Wm, Mm, bb = np.asarray(W), np.asarray(M), np.asarray(b)
    row_map = _chunk_row_map(3 * L, L, Lp)
    for c in range(C):
        sl = slice(c * 3 * L, (c + 1) * 3 * L)
        flat.extend(_pad_masked_linear_T(Wm[sl], Mm[sl], bb[sl], 3 * Lp, Hp, row_map))
    return flat


def prepare_fused_params(raw, L, Lp, Hp, C):
    flat = []
    for blk in raw['maf_blocks']:
        flat.extend(_prepare_made_layers(blk['layers'], L, Lp, Hp))
        lg = np.asarray(blk['log_gamma'], np.float32)
        gamma = np.ones((Lp, 1), np.float32); gamma[:L, 0] = np.exp(lg)   # pre-folded exp(log_gamma)
        lgp = np.zeros((Lp, 1), np.float32);  lgp[:L, 0] = lg
        beta = np.zeros((Lp, 1), np.float32); beta[:L, 0] = np.asarray(blk['beta'], np.float32)
        flat.extend([jnp.asarray(gamma), jnp.asarray(lgp), jnp.asarray(beta)])
    flat.extend(_prepare_head_layers(raw['mog_layers'], L, Lp, Hp, C))
    return flat


# ----------------------------------------------------------------------------
# Main
# ----------------------------------------------------------------------------

if __name__ == "__main__":
    n_blocks, n_components = 2, 3
    input_size, hidden_size, n_hidden = 8, 32, 1
    batch = 128                         # batch maps onto the 128-wide lane axis

    key = jax.random.PRNGKey(0)
    key, pkey, xkey = jax.random.split(key, 3)
    raw = build_raw_params(pkey, n_blocks, n_components, input_size, hidden_size, n_hidden)
    x = jax.random.normal(xkey, (batch, input_size), jnp.float32)

    Lp = _ceil_to(input_size, 8)        # features live on the 8-sublane axis (L=8 is exact)
    Hp = _ceil_to(hidden_size, 8)
    flat = prepare_fused_params(raw, input_size, Lp, Hp, n_components)
    n_layers = n_hidden + 2

    # Static config is bound via partial (Python ints), NOT carried in the jit pytree.
    fwd_pallas = jax.jit(functools.partial(
        mafmog_fused_forward, n_blocks=n_blocks, n_layers=n_layers,
        C=n_components, L=input_size, Lp=Lp))
    fwd_ref = jax.jit(functools.partial(mafmog_forward_ref, C=n_components, L=input_size))

    u, sum_ld = fwd_pallas(flat, x)
    jax.block_until_ready((u, sum_ld))

    u_ref, sum_ld_ref = fwd_ref(raw, x)
    jax.block_until_ready((u_ref, sum_ld_ref))

    assert u.shape == (batch, n_components, input_size)
    assert sum_ld.shape == (batch, n_components, input_size)
    np.testing.assert_allclose(np.asarray(u), np.asarray(u_ref), rtol=5e-3, atol=5e-3)
    np.testing.assert_allclose(np.asarray(sum_ld), np.asarray(sum_ld_ref), rtol=5e-3, atol=5e-3)

    print("KERNEL_OK")
</pallas_src>

<mosaic_0001>
module attributes {stable_mosaic.version = 11 : i64} {
  func.func @_mafmog_fused_kernel(%arg0: memref<8x128xf32, #tpu.memory_space<vmem>>, %arg1: memref<32x8xf32, #tpu.memory_space<vmem>>, %arg2: memref<32x1xf32, #tpu.memory_space<vmem>>, %arg3: memref<32x32xf32, #tpu.memory_space<vmem>>, %arg4: memref<32x1xf32, #tpu.memory_space<vmem>>, %arg5: memref<16x32xf32, #tpu.memory_space<vmem>>, %arg6: memref<16x1xf32, #tpu.memory_space<vmem>>, %arg7: memref<8x1xf32, #tpu.memory_space<vmem>>, %arg8: memref<8x1xf32, #tpu.memory_space<vmem>>, %arg9: memref<8x1xf32, #tpu.memory_space<vmem>>, %arg10: memref<32x8xf32, #tpu.memory_space<vmem>>, %arg11: memref<32x1xf32, #tpu.memory_space<vmem>>, %arg12: memref<32x32xf32, #tpu.memory_space<vmem>>, %arg13: memref<32x1xf32, #tpu.memory_space<vmem>>, %arg14: memref<16x32xf32, #tpu.memory_space<vmem>>, %arg15: memref<16x1xf32, #tpu.memory_space<vmem>>, %arg16: memref<8x1xf32, #tpu.memory_space<vmem>>, %arg17: memref<8x1xf32, #tpu.memory_space<vmem>>, %arg18: memref<8x1xf32, #tpu.memory_space<vmem>>, %arg19: memref<32x8xf32, #tpu.memory_space<vmem>>, %arg20: memref<32x1xf32, #tpu.memory_space<vmem>>, %arg21: memref<32x32xf32, #tpu.memory_space<vmem>>, %arg22: memref<32x1xf32, #tpu.memory_space<vmem>>, %arg23: memref<24x32xf32, #tpu.memory_space<vmem>>, %arg24: memref<24x1xf32, #tpu.memory_space<vmem>>, %arg25: memref<24x32xf32, #tpu.memory_space<vmem>>, %arg26: memref<24x1xf32, #tpu.memory_space<vmem>>, %arg27: memref<24x32xf32, #tpu.memory_space<vmem>>, %arg28: memref<24x1xf32, #tpu.memory_space<vmem>>, %arg29: memref<24x128xf32, #tpu.memory_space<vmem>>, %arg30: memref<24x128xf32, #tpu.memory_space<vmem>>) attributes {dimension_semantics = [], scalar_prefetch = 0 : i64, scratch_operands = 0 : i64, tpu.core_type = #tpu.core_type<tc>} {
    %c0 = arith.constant 0 : index
    %c0_0 = arith.constant 0 : index
    %0 = vector.load %arg0[%c0, %c0_0] : memref<8x128xf32, #tpu.memory_space<vmem>>, vector<8x128xf32>
    %cst = arith.constant 0.000000e+00 : f32
    %1 = vector.broadcast %cst : f32 to vector<8x128xf32>
    %2 = tpu.iota {dimensions = array<i32: 1>} : vector<1x128xi32>
    %c128_i32 = arith.constant 128 : i32
    %3 = vector.broadcast %c128_i32 : i32 to vector<1x128xi32>
    %4 = arith.cmpi slt, %2, %3 : vector<1x128xi32>
    %5 = arith.extui %4 : vector<1x128xi1> to vector<1x128xi32>
    %6 = arith.sitofp %5 : vector<1x128xi32> to vector<1x128xf32>
    %c0_1 = arith.constant 0 : index
    %c0_2 = arith.constant 0 : index
    %7 = vector.load %arg1[%c0_1, %c0_2] : memref<32x8xf32, #tpu.memory_space<vmem>>, vector<32x8xf32>
    %cst_3 = arith.constant dense<0.000000e+00> : vector<32x128xf32>
    %8 = tpu.matmul %7, %0, %cst_3 {dimension_numbers = #tpu.dot_dimension_numbers<[1], [0], [0], [1], [0, 0, 1, 1], [], []>} : vector<32x8xf32>, vector<8x128xf32>, vector<32x128xf32> -> vector<32x128xf32>
    %c0_4 = arith.constant 0 : index
    %c0_5 = arith.constant 0 : index
    %9 = vector.load %arg2[%c0_4, %c0_5] : memref<32x1xf32, #tpu.memory_space<vmem>>, vector<32x1xf32>
    %10 = vector.broadcast %9 : vector<32x1xf32> to vector<32x128xf32>
    %11 = arith.addf %8, %10 : vector<32x128xf32>
    %c0_6 = arith.constant 0 : index
    %c0_7 = arith.constant 0 : index
    %12 = vector.load %arg3[%c0_6, %c0_7] : memref<32x32xf32, #tpu.memory_space<vmem>>, vector<32x32xf32>
    %cst_8 = arith.constant 0.000000e+00 : f32
    %13 = vector.broadcast %cst_8 : f32 to vector<32x128xf32>
    %14 = arith.maximumf %11, %13 : vector<32x128xf32>
    %cst_9 = arith.constant dense<0.000000e+00> : vector<32x128xf32>
    %15 = tpu.matmul %12, %14, %cst_9 {dimension_numbers = #tpu.dot_dimension_numbers<[1], [0], [0], [1], [0, 0, 1, 1], [], []>} : vector<32x32xf32>, vector<32x128xf32>, vector<32x128xf32> -> vector<32x128xf32>
    %c0_10 = arith.constant 0 : index
    %c0_11 = arith.constant 0 : index
    %16 = vector.load %arg4[%c0_10, %c0_11] : memref<32x1xf32, #tpu.memory_space<vmem>>, vector<32x1xf32>
    %17 = vector.broadcast %16 : vector<32x1xf32> to vector<32x128xf32>
    %18 = arith.addf %15, %17 : vector<32x128xf32>
    %c0_12 = arith.constant 0 : index
    %c0_13 = arith.constant 0 : index
    %19 = vector.load %arg5[%c0_12, %c0_13] : memref<16x32xf32, #tpu.memory_space<vmem>>, vector<16x32xf32>
    %cst_14 = arith.constant 0.000000e+00 : f32
    %20 = vector.broadcast %cst_14 : f32 to vector<32x128xf32>
    %21 = arith.maximumf %18, %20 : vector<32x128xf32>
    %cst_15 = arith.constant dense<0.000000e+00> : vector<16x128xf32>
    %22 = tpu.matmul %19, %21, %cst_15 {dimension_numbers = #tpu.dot_dimension_numbers<[1], [0], [0], [1], [0, 0, 1, 1], [], []>} : vector<16x32xf32>, vector<32x128xf32>, vector<16x128xf32> -> vector<16x128xf32>
    %c0_16 = arith.constant 0 : index
    %c0_17 = arith.constant 0 : index
    %23 = vector.load %arg6[%c0_16, %c0_17] : memref<16x1xf32, #tpu.memory_space<vmem>>, vector<16x1xf32>
    %24 = vector.broadcast %23 : vector<16x1xf32> to vector<16x128xf32>
    %25 = arith.addf %22, %24 : vector<16x128xf32>
    %26 = vector.extract_strided_slice %25 {offsets = [0, 0], sizes = [8, 128], strides = [1, 1]} : vector<16x128xf32> to vector<8x128xf32>
    %27 = vector.extract_strided_slice %25 {offsets = [8, 0], sizes = [8, 128], strides = [1, 1]} : vector<16x128xf32> to vector<8x128xf32>
    %28 = arith.subf %0, %26 : vector<8x128xf32>
    %cst_18 = arith.constant 0.000000e+00 : f32
    %29 = vector.broadcast %cst_18 : f32 to vector<8x128xf32>
    %30 = arith.subf %29, %27 : vector<8x128xf32>
    %31 = math.exp %30 : vector<8x128xf32>
    %32 = arith.mulf %28, %31 : vector<8x128xf32>
    %33 = arith.subf %1, %27 : vector<8x128xf32>
    %34 = vector.broadcast %6 : vector<1x128xf32> to vector<8x128xf32>
    %35 = arith.mulf %32, %34 : vector<8x128xf32>
    %cst_19 = arith.constant dense<0.000000e+00> : vector<8xf32>
    %36 = vector.multi_reduction <add>, %35, %cst_19 [1] : vector<8x128xf32> to vector<8xf32>
    %37 = vector.shape_cast %36 : vector<8xf32> to vector<8x1xf32>
    %cst_20 = arith.constant 7.812500e-03 : f32
    %38 = vector.broadcast %cst_20 : f32 to vector<8x1xf32>
    %39 = arith.mulf %37, %38 : vector<8x1xf32>
    %40 = vector.broadcast %39 : vector<8x1xf32> to vector<8x128xf32>
    %41 = arith.subf %32, %40 : vector<8x128xf32>
    %42 = vector.broadcast %6 : vector<1x128xf32> to vector<8x128xf32>
    %43 = arith.mulf %41, %42 : vector<8x128xf32>
    %44 = arith.mulf %43, %43 : vector<8x128xf32>
    %cst_21 = arith.constant dense<0.000000e+00> : vector<8xf32>
    %45 = vector.multi_reduction <add>, %44, %cst_21 [1] : vector<8x128xf32> to vector<8xf32>
    %46 = vector.shape_cast %45 : vector<8xf32> to vector<8x1xf32>
    %cst_22 = arith.constant 0.00787401571 : f32
    %47 = vector.broadcast %cst_22 : f32 to vector<8x1xf32>
    %48 = arith.mulf %46, %47 : vector<8x1xf32>
    %cst_23 = arith.constant 9.99999974E-6 : f32
    %49 = vector.broadcast %cst_23 : f32 to vector<8x1xf32>
    %50 = arith.addf %48, %49 : vector<8x1xf32>
    %51 = math.rsqrt %50 : vector<8x1xf32>
    %c0_24 = arith.constant 0 : index
    %c0_25 = arith.constant 0 : index
    %52 = vector.load %arg7[%c0_24, %c0_25] : memref<8x1xf32, #tpu.memory_space<vmem>>, vector<8x1xf32>
    %53 = vector.broadcast %39 : vector<8x1xf32> to vector<8x128xf32>
    %54 = arith.subf %32, %53 : vector<8x128xf32>
    %55 = vector.broadcast %51 : vector<8x1xf32> to vector<8x128xf32>
    %56 = arith.mulf %54, %55 : vector<8x128xf32>
    %57 = vector.broadcast %52 : vector<8x1xf32> to vector<8x128xf32>
    %58 = arith.mulf %57, %56 : vector<8x128xf32>
    %c0_26 = arith.constant 0 : index
    %c0_27 = arith.constant 0 : index
    %59 = vector.load %arg9[%c0_26, %c0_27] : memref<8x1xf32, #tpu.memory_space<vmem>>, vector<8x1xf32>
    %60 = vector.broadcast %59 : vector<8x1xf32> to vector<8x128xf32>
    %61 = arith.addf %58, %60 : vector<8x128xf32>
    %c0_28 = arith.constant 0 : index
    %c0_29 = arith.constant 0 : index
    %62 = vector.load %arg8[%c0_28, %c0_29] : memref<8x1xf32, #tpu.memory_space<vmem>>, vector<8x1xf32>
    %cst_30 = arith.constant 9.99999974E-6 : f32
    %63 = vector.broadcast %cst_30 : f32 to vector<8x1xf32>
    %64 = arith.addf %48, %63 : vector<8x1xf32>
    %65 = math.log %64 : vector<8x1xf32>
    %cst_31 = arith.constant 5.000000e-01 : f32
    %66 = vector.broadcast %cst_31 : f32 to vector<8x1xf32>
    %67 = arith.mulf %66, %65 : vector<8x1xf32>
    %68 = arith.subf %62, %67 : vector<8x1xf32>
    %69 = vector.broadcast %68 : vector<8x1xf32> to vector<8x128xf32>
    %70 = arith.addf %33, %69 : vector<8x128xf32>
    %c0_32 = arith.constant 0 : index
    %c0_33 = arith.constant 0 : index
    %71 = vector.load %arg10[%c0_32, %c0_33] : memref<32x8xf32, #tpu.memory_space<vmem>>, vector<32x8xf32>
    %cst_34 = arith.constant dense<0.000000e+00> : vector<32x128xf32>
    %72 = tpu.matmul %71, %61, %cst_34 {dimension_numbers = #tpu.dot_dimension_numbers<[1], [0], [0], [1], [0, 0, 1, 1], [], []>} : vector<32x8xf32>, vector<8x128xf32>, vector<32x128xf32> -> vector<32x128xf32>
    %c0_35 = arith.constant 0 : index
    %c0_36 = arith.constant 0 : index
    %73 = vector.load %arg11[%c0_35, %c0_36] : memref<32x1xf32, #tpu.memory_space<vmem>>, vector<32x1xf32>
    %74 = vector.broadcast %73 : vector<32x1xf32> to vector<32x128xf32>
    %75 = arith.addf %72, %74 : vector<32x128xf32>
    %c0_37 = arith.constant 0 : index
    %c0_38 = arith.constant 0 : index
    %76 = vector.load %arg12[%c0_37, %c0_38] : memref<32x32xf32, #tpu.memory_space<vmem>>, vector<32x32xf32>
    %cst_39 = arith.constant 0.000000e+00 : f32
    %77 = vector.broadcast %cst_39 : f32 to vector<32x128xf32>
    %78 = arith.maximumf %75, %77 : vector<32x128xf32>
    %cst_40 = arith.constant dense<0.000000e+00> : vector<32x128xf32>
    %79 = tpu.matmul %76, %78, %cst_40 {dimension_numbers = #tpu.dot_dimension_numbers<[1], [0], [0], [1], [0, 0, 1, 1], [], []>} : vector<32x32xf32>, vector<32x128xf32>, vector<32x128xf32> -> vector<32x128xf32>
    %c0_41 = arith.constant 0 : index
    %c0_42 = arith.constant 0 : index
    %80 = vector.load %arg13[%c0_41, %c0_42] : memref<32x1xf32, #tpu.memory_space<vmem>>, vector<32x1xf32>
    %81 = vector.broadcast %80 : vector<32x1xf32> to vector<32x128xf32>
    %82 = arith.addf %79, %81 : vector<32x128xf32>
    %c0_43 = arith.constant 0 : index
    %c0_44 = arith.constant 0 : index
    %83 = vector.load %arg14[%c0_43, %c0_44] : memref<16x32xf32, #tpu.memory_space<vmem>>, vector<16x32xf32>
    %cst_45 = arith.constant 0.000000e+00 : f32
    %84 = vector.broadcast %cst_45 : f32 to vector<32x128xf32>
    %85 = arith.maximumf %82, %84 : vector<32x128xf32>
    %cst_46 = arith.constant dense<0.000000e+00> : vector<16x128xf32>
    %86 = tpu.matmul %83, %85, %cst_46 {dimension_numbers = #tpu.dot_dimension_numbers<[1], [0], [0], [1], [0, 0, 1, 1], [], []>} : vector<16x32xf32>, vector<32x128xf32>, vector<16x128xf32> -> vector<16x128xf32>
    %c0_47 = arith.constant 0 : index
    %c0_48 = arith.constant 0 : index
    %87 = vector.load %arg15[%c0_47, %c0_48] : memref<16x1xf32, #tpu.memory_space<vmem>>, vector<16x1xf32>
    %88 = vector.broadcast %87 : vector<16x1xf32> to vector<16x128xf32>
    %89 = arith.addf %86, %88 : vector<16x128xf32>
    %90 = vector.extract_strided_slice %89 {offsets = [0, 0], sizes = [8, 128], strides = [1, 1]} : vector<16x128xf32> to vector<8x128xf32>
    %91 = vector.extract_strided_slice %89 {offsets = [8, 0], sizes = [8, 128], strides = [1, 1]} : vector<16x128xf32> to vector<8x128xf32>
    %92 = arith.subf %61, %90 : vector<8x128xf32>
    %cst_49 = arith.constant 0.000000e+00 : f32
    %93 = vector.broadcast %cst_49 : f32 to vector<8x128xf32>
    %94 = arith.subf %93, %91 : vector<8x128xf32>
    %95 = math.exp %94 : vector<8x128xf32>
    %96 = arith.mulf %92, %95 : vector<8x128xf32>
    %97 = arith.subf %70, %91 : vector<8x128xf32>
    %98 = vector.broadcast %6 : vector<1x128xf32> to vector<8x128xf32>
    %99 = arith.mulf %96, %98 : vector<8x128xf32>
    %cst_50 = arith.constant dense<0.000000e+00> : vector<8xf32>
    %100 = vector.multi_reduction <add>, %99, %cst_50 [1] : vector<8x128xf32> to vector<8xf32>
    %101 = vector.shape_cast %100 : vector<8xf32> to vector<8x1xf32>
    %cst_51 = arith.constant 7.812500e-03 : f32
    %102 = vector.broadcast %cst_51 : f32 to vector<8x1xf32>
    %103 = arith.mulf %101, %102 : vector<8x1xf32>
    %104 = vector.broadcast %103 : vector<8x1xf32> to vector<8x128xf32>
    %105 = arith.subf %96, %104 : vector<8x128xf32>
    %106 = vector.broadcast %6 : vector<1x128xf32> to vector<8x128xf32>
    %107 = arith.mulf %105, %106 : vector<8x128xf32>
    %108 = arith.mulf %107, %107 : vector<8x128xf32>
    %cst_52 = arith.constant dense<0.000000e+00> : vector<8xf32>
    %109 = vector.multi_reduction <add>, %108, %cst_52 [1] : vector<8x128xf32> to vector<8xf32>
    %110 = vector.shape_cast %109 : vector<8xf32> to vector<8x1xf32>
    %cst_53 = arith.constant 0.00787401571 : f32
    %111 = vector.broadcast %cst_53 : f32 to vector<8x1xf32>
    %112 = arith.mulf %110, %111 : vector<8x1xf32>
    %cst_54 = arith.constant 9.99999974E-6 : f32
    %113 = vector.broadcast %cst_54 : f32 to vector<8x1xf32>
    %114 = arith.addf %112, %113 : vector<8x1xf32>
    %115 = math.rsqrt %114 : vector<8x1xf32>
    %c0_55 = arith.constant 0 : index
    %c0_56 = arith.constant 0 : index
    %116 = vector.load %arg16[%c0_55, %c0_56] : memref<8x1xf32, #tpu.memory_space<vmem>>, vector<8x1xf32>
    %117 = vector.broadcast %103 : vector<8x1xf32> to vector<8x128xf32>
    %118 = arith.subf %96, %117 : vector<8x128xf32>
    %119 = vector.broadcast %115 : vector<8x1xf32> to vector<8x128xf32>
    %120 = arith.mulf %118, %119 : vector<8x128xf32>
    %121 = vector.broadcast %116 : vector<8x1xf32> to vector<8x128xf32>
    %122 = arith.mulf %121, %120 : vector<8x128xf32>
    %c0_57 = arith.constant 0 : index
    %c0_58 = arith.constant 0 : index
    %123 = vector.load %arg18[%c0_57, %c0_58] : memref<8x1xf32, #tpu.memory_space<vmem>>, vector<8x1xf32>
    %124 = vector.broadcast %123 : vector<8x1xf32> to vector<8x128xf32>
    %125 = arith.addf %122, %124 : vector<8x128xf32>
    %c0_59 = arith.constant 0 : index
    %c0_60 = arith.constant 0 : index
    %126 = vector.load %arg17[%c0_59, %c0_60] : memref<8x1xf32, #tpu.memory_space<vmem>>, vector<8x1xf32>
    %cst_61 = arith.constant 9.99999974E-6 : f32
    %127 = vector.broadcast %cst_61 : f32 to vector<8x1xf32>
    %128 = arith.addf %112, %127 : vector<8x1xf32>
    %129 = math.log %128 : vector<8x1xf32>
    %cst_62 = arith.constant 5.000000e-01 : f32
    %130 = vector.broadcast %cst_62 : f32 to vector<8x1xf32>
    %131 = arith.mulf %130, %129 : vector<8x1xf32>
    %132 = arith.subf %126, %131 : vector<8x1xf32>
    %133 = vector.broadcast %132 : vector<8x1xf32> to vector<8x128xf32>
    %134 = arith.addf %97, %133 : vector<8x128xf32>
    %c0_63 = arith.constant 0 : index
    %c0_64 = arith.constant 0 : index
    %135 = vector.load %arg19[%c0_63, %c0_64] : memref<32x8xf32, #tpu.memory_space<vmem>>, vector<32x8xf32>
    %cst_65 = arith.constant dense<0.000000e+00> : vector<32x128xf32>
    %136 = tpu.matmul %135, %125, %cst_65 {dimension_numbers = #tpu.dot_dimension_numbers<[1], [0], [0], [1], [0, 0, 1, 1], [], []>} : vector<32x8xf32>, vector<8x128xf32>, vector<32x128xf32> -> vector<32x128xf32>
    %c0_66 = arith.constant 0 : index
    %c0_67 = arith.constant 0 : index
    %137 = vector.load %arg20[%c0_66, %c0_67] : memref<32x1xf32, #tpu.memory_space<vmem>>, vector<32x1xf32>
    %138 = vector.broadcast %137 : vector<32x1xf32> to vector<32x128xf32>
    %139 = arith.addf %136, %138 : vector<32x128xf32>
    %c0_68 = arith.constant 0 : index
    %c0_69 = arith.constant 0 : index
    %140 = vector.load %arg21[%c0_68, %c0_69] : memref<32x32xf32, #tpu.memory_space<vmem>>, vector<32x32xf32>
    %cst_70 = arith.constant 0.000000e+00 : f32
    %141 = vector.broadcast %cst_70 : f32 to vector<32x128xf32>
    %142 = arith.maximumf %139, %141 : vector<32x128xf32>
    %cst_71 = arith.constant dense<0.000000e+00> : vector<32x128xf32>
    %143 = tpu.matmul %140, %142, %cst_71 {dimension_numbers = #tpu.dot_dimension_numbers<[1], [0], [0], [1], [0, 0, 1, 1], [], []>} : vector<32x32xf32>, vector<32x128xf32>, vector<32x128xf32> -> vector<32x128xf32>
    %c0_72 = arith.constant 0 : index
    %c0_73 = arith.constant 0 : index
    %144 = vector.load %arg22[%c0_72, %c0_73] : memref<32x1xf32, #tpu.memory_space<vmem>>, vector<32x1xf32>
    %145 = vector.broadcast %144 : vector<32x1xf32> to vector<32x128xf32>
    %146 = arith.addf %143, %145 : vector<32x128xf32>
    %cst_74 = arith.constant 0.000000e+00 : f32
    %147 = vector.broadcast %cst_74 : f32 to vector<32x128xf32>
    %148 = arith.maximumf %146, %147 : vector<32x128xf32>
    %c0_75 = arith.constant 0 : index
    %c0_76 = arith.constant 0 : index
    %149 = vector.load %arg23[%c0_75, %c0_76] : memref<24x32xf32, #tpu.memory_space<vmem>>, vector<24x32xf32>
    %cst_77 = arith.constant dense<0.000000e+00> : vector<24x128xf32>
    %150 = tpu.matmul %149, %148, %cst_77 {dimension_numbers = #tpu.dot_dimension_numbers<[1], [0], [0], [1], [0, 0, 1, 1], [], []>} : vector<24x32xf32>, vector<32x128xf32>, vector<24x128xf32> -> vector<24x128xf32>
    %c0_78 = arith.constant 0 : index
    %c0_79 = arith.constant 0 : index
    %151 = vector.load %arg24[%c0_78, %c0_79] : memref<24x1xf32, #tpu.memory_space<vmem>>, vector<24x1xf32>
    %152 = vector.broadcast %151 : vector<24x1xf32> to vector<24x128xf32>
    %153 = arith.addf %150, %152 : vector<24x128xf32>
    %154 = vector.extract_strided_slice %153 {offsets = [0, 0], sizes = [8, 128], strides = [1, 1]} : vector<24x128xf32> to vector<8x128xf32>
    %155 = vector.extract_strided_slice %153 {offsets = [8, 0], sizes = [8, 128], strides = [1, 1]} : vector<24x128xf32> to vector<8x128xf32>
    %156 = arith.subf %125, %154 : vector<8x128xf32>
    %cst_80 = arith.constant 0.000000e+00 : f32
    %157 = vector.broadcast %cst_80 : f32 to vector<8x128xf32>
    %158 = arith.subf %157, %155 : vector<8x128xf32>
    %159 = math.exp %158 : vector<8x128xf32>
    %160 = arith.mulf %156, %159 : vector<8x128xf32>
    %c0_81 = arith.constant 0 : index
    %c0_82 = arith.constant 0 : index
    %161 = vector.load %arg29[%c0_81, %c0_82] : memref<24x128xf32, #tpu.memory_space<vmem>>, vector<8x128xf32>
    tpu.vector_store %arg29[%c0_81, %c0_82], %160 {strides = array<i32>} : memref<24x128xf32, #tpu.memory_space<vmem>>, vector<8x128xf32>,
    %162 = arith.subf %134, %155 : vector<8x128xf32>
    %c0_83 = arith.constant 0 : index
    %c0_84 = arith.constant 0 : index
    %163 = vector.load %arg30[%c0_83, %c0_84] : memref<24x128xf32, #tpu.memory_space<vmem>>, vector<8x128xf32>
    tpu.vector_store %arg30[%c0_83, %c0_84], %162 {strides = array<i32>} : memref<24x128xf32, #tpu.memory_space<vmem>>, vector<8x128xf32>,
    %c0_85 = arith.constant 0 : index
    %c0_86 = arith.constant 0 : index
    %164 = vector.load %arg25[%c0_85, %c0_86] : memref<24x32xf32, #tpu.memory_space<vmem>>, vector<24x32xf32>
    %cst_87 = arith.constant dense<0.000000e+00> : vector<24x128xf32>
    %165 = tpu.matmul %164, %148, %cst_87 {dimension_numbers = #tpu.dot_dimension_numbers<[1], [0], [0], [1], [0, 0, 1, 1], [], []>} : vector<24x32xf32>, vector<32x128xf32>, vector<24x128xf32> -> vector<24x128xf32>
    %c0_88 = arith.constant 0 : index
    %c0_89 = arith.constant 0 : index
    %166 = vector.load %arg26[%c0_88, %c0_89] : memref<24x1xf32, #tpu.memory_space<vmem>>, vector<24x1xf32>
    %167 = vector.broadcast %166 : vector<24x1xf32> to vector<24x128xf32>
    %168 = arith.addf %165, %167 : vector<24x128xf32>
    %169 = vector.extract_strided_slice %168 {offsets = [0, 0], sizes = [8, 128], strides = [1, 1]} : vector<24x128xf32> to vector<8x128xf32>
    %170 = vector.extract_strided_slice %168 {offsets = [8, 0], sizes = [8, 128], strides = [1, 1]} : vector<24x128xf32> to vector<8x128xf32>
    %171 = arith.subf %125, %169 : vector<8x128xf32>
    %cst_90 = arith.constant 0.000000e+00 : f32
    %172 = vector.broadcast %cst_90 : f32 to vector<8x128xf32>
    %173 = arith.subf %172, %170 : vector<8x128xf32>
    %174 = math.exp %173 : vector<8x128xf32>
    %175 = arith.mulf %171, %174 : vector<8x128xf32>
    %c8 = arith.constant 8 : index
    %c0_91 = arith.constant 0 : index
    %176 = vector.load %arg29[%c8, %c0_91] : memref<24x128xf32, #tpu.memory_space<vmem>>, vector<8x128xf32>
    tpu.vector_store %arg29[%c8, %c0_91], %175 {strides = array<i32>} : memref<24x128xf32, #tpu.memory_space<vmem>>, vector<8x128xf32>,
    %177 = arith.subf %134, %170 : vector<8x128xf32>
    %c8_92 = arith.constant 8 : index
    %c0_93 = arith.constant 0 : index
    %178 = vector.load %arg30[%c8_92, %c0_93] : memref<24x128xf32, #tpu.memory_space<vmem>>, vector<8x128xf32>
    tpu.vector_store %arg30[%c8_92, %c0_93], %177 {strides = array<i32>} : memref<24x128xf32, #tpu.memory_space<vmem>>, vector<8x128xf32>,
    %c0_94 = arith.constant 0 : index
    %c0_95 = arith.constant 0 : index
    %179 = vector.load %arg27[%c0_94, %c0_95] : memref<24x32xf32, #tpu.memory_space<vmem>>, vector<24x32xf32>
    %cst_96 = arith.constant dense<0.000000e+00> : vector<24x128xf32>
    %180 = tpu.matmul %179, %148, %cst_96 {dimension_numbers = #tpu.dot_dimension_numbers<[1], [0], [0], [1], [0, 0, 1, 1], [], []>} : vector<24x32xf32>, vector<32x128xf32>, vector<24x128xf32> -> vector<24x128xf32>
    %c0_97 = arith.constant 0 : index
    %c0_98 = arith.constant 0 : index
    %181 = vector.load %arg28[%c0_97, %c0_98] : memref<24x1xf32, #tpu.memory_space<vmem>>, vector<24x1xf32>
    %182 = vector.broadcast %181 : vector<24x1xf32> to vector<24x128xf32>
    %183 = arith.addf %180, %182 : vector<24x128xf32>
    %184 = vector.extract_strided_slice %183 {offsets = [0, 0], sizes = [8, 128], strides = [1, 1]} : vector<24x128xf32> to vector<8x128xf32>
    %185 = vector.extract_strided_slice %183 {offsets = [8, 0], sizes = [8, 128], strides = [1, 1]} : vector<24x128xf32> to vector<8x128xf32>
    %186 = arith.subf %125, %184 : vector<8x128xf32>
    %cst_99 = arith.constant 0.000000e+00 : f32
    %187 = vector.broadcast %cst_99 : f32 to vector<8x128xf32>
    %188 = arith.subf %187, %185 : vector<8x128xf32>
    %189 = math.exp %188 : vector<8x128xf32>
    %190 = arith.mulf %186, %189 : vector<8x128xf32>
    %c16 = arith.constant 16 : index
    %c0_100 = arith.constant 0 : index
    %191 = vector.load %arg29[%c16, %c0_100] : memref<24x128xf32, #tpu.memory_space<vmem>>, vector<8x128xf32>
    tpu.vector_store %arg29[%c16, %c0_100], %190 {strides = array<i32>} : memref<24x128xf32, #tpu.memory_space<vmem>>, vector<8x128xf32>,
    %192 = arith.subf %134, %185 : vector<8x128xf32>
    %c16_101 = arith.constant 16 : index
    %c0_102 = arith.constant 0 : index
    %193 = vector.load %arg30[%c16_101, %c0_102] : memref<24x128xf32, #tpu.memory_space<vmem>>, vector<8x128xf32>
    tpu.vector_store %arg30[%c16_101, %c0_102], %192 {strides = array<i32>} : memref<24x128xf32, #tpu.memory_space<vmem>>, vector<8x128xf32>,
    return
  }
}

</mosaic_0001>

<bundles_post_ra>
// kernel: mafmog_fused_forward.1
= control target key start
LH: loop header
LB: loop body
LE: loop exit
PB: predicated region body
PF: predicated region fallthrough
CT: control target
= control target key end

     0   :  { %s1945_s6 = smov 1   ;;  %s1946_s10 = smov 2   ;;  %s2327_s0 = inlined_call_operand.smem [shape: u32[31], index: -1, kind: input, shape index: {}] }
   0x1   :  { %s1990_s5 = sld [smem:[%s2327_s0]]   ;;  %s1947_s14 = smov 3  }
   0x2   :  { %s1995_s9 = sld [smem:[%s2327_s0 + %s1945_s6]]   ;;  %s1948_s18 = smov 4  }
   0x3   :  { %s2000_s13 = sld [smem:[%s2327_s0 + %s1946_s10]]   ;;  %s1949_s22 = smov 5  }
   0x4   :  { %s2005_s17 = sld [smem:[%s2327_s0 + %s1947_s14]]   ;;  %s1950_s26 = smov 6  }
   0x5   :  { %s2010_s21 = sld [smem:[%s2327_s0 + %s1948_s18]]   ;;  %s1951_s30 = smov 7  }
   0x6   :  { %s2015_s25 = sld [smem:[%s2327_s0 + %s1949_s22]]   ;;  %s1952_s4 = smov 8  }
   0x7   :  { %s2020_s29 = sld [smem:[%s2327_s0 + %s1950_s26]]   ;;  %s1953_s10 = smov 9  }
   0x8   :  { %s2025_s3 = sld [smem:[%s2327_s0 + %s1951_s30]]   ;;  %s1954_s15 = smov 10  }
   0x9   :  { %s2030_s8 = sld [smem:[%s2327_s0 + %s1952_s4]]   ;;  %s1955_s20 = smov 11  }
   0xa   :  { %s2035_s14 = sld [smem:[%s2327_s0 + %s1953_s10]]   ;;  %s1956_s26 = smov 12  }
   0xb   :  { %s2040_s19 = sld [smem:[%s2327_s0 + %s1954_s15]]   ;;  %s1957_s1 = smov 13  }
   0xc   :  { %s2045_s24 = sld [smem:[%s2327_s0 + %s1955_s20]]   ;;  %s1958_s7 = smov 14  }
   0xd   :  { %s2050_s30 = sld [smem:[%s2327_s0 + %s1956_s26]]   ;;  %s1959_s15 = smov 15  }
   0xe   :  { %s2055_s6 = sld [smem:[%s2327_s0 + %s1957_s1]]   ;;  %s1960_s22 = smov 16  }
   0xf   :  { %2337 = sst [smem:[#allocation8_spill]] %s2030_s8  ;;  %s1961_s28 = smov 17  }
  0x10   :  { %s2060_s12 = sld [smem:[%s2327_s0 + %s1958_s7]]   ;;  %s1962_s7 = smov 18  }
  0x11   :  { %s2065_s20 = sld [smem:[%s2327_s0 + %s1959_s15]]   ;;  %s1963_s15 = smov 19  }
  0x12   :  { %s2070_s27 = sld [smem:[%s2327_s0 + %s1960_s22]]   ;;  %s1964_s22 = smov 20  }
  0x13   :  { %s2075_s4 = sld [smem:[%s2327_s0 + %s1961_s28]]   ;;  %s1965_s28 = smov 21  }
  0x14   :  { %s2080_s8 = sld [smem:[%s2327_s0 + %s1962_s7]]   ;;  %s1966_s7 = smov 22  }
  0x16   :  { %2338 = sst [smem:[#allocation9_spill]] %s2060_s12 }
  0x17   :  { %s2085_s12 = sld [smem:[%s2327_s0 + %s1963_s15]]   ;;  %s1967_s15 = smov 23  }
  0x18   :  { %2339 = sst [smem:[#allocation10_spill]] %s2070_s27 }
  0x19   :  { %2340 = sst [smem:[#allocation11_spill]] %s2075_s4 }
  0x1a   :  { %2341 = sst [smem:[#allocation12_spill]] %s2080_s8 }
  0x1b   :  { %s2090_s27 = sld [smem:[%s2327_s0 + %s1964_s22]]   ;;  %s1968_s22 = smov 24  }
  0x1c   :  { %s2095_s4 = sld [smem:[%s2327_s0 + %s1965_s28]]   ;;  %s1969_s28 = smov 25  }
  0x1d   :  { %2342 = sst [smem:[#allocation13_spill]] %s2085_s12 }
  0x1e   :  { %s2100_s8 = sld [smem:[%s2327_s0 + %s1966_s7]]   ;;  %s1970_s7 = smov 26  }
  0x1f   :  { %s2105_s12 = sld [smem:[%s2327_s0 + %s1967_s15]]   ;;  %s1971_s15 = smov 27  }
  0x21   :  { %2343 = sst [smem:[#allocation14_spill]] %s2090_s27 }
  0x22   :  { %2344 = sst [smem:[#allocation15_spill]] %s2095_s4 }
  0x23   :  { %s2110_s27 = sld [smem:[%s2327_s0 + %s1968_s22]]   ;;  %s1972_s22 = smov 28  }
  0x24   :  { %2345 = sst [smem:[#allocation16_spill]] %s2100_s8 }
  0x25   :  { %2346 = sst [smem:[#allocation17_spill]] %s2105_s12 }
  0x26   :  { %s2115_s4 = sld [smem:[%s2327_s0 + %s1969_s28]]   ;;  %s1973_s28 = smov 29  }
  0x27   :  { %s2120_s8 = sld [smem:[%s2327_s0 + %s1970_s7]]   ;;  %s1974_s7 = smov 30  }
  0x28   :  { %s2125_s12 = sld [smem:[%s2327_s0 + %s1971_s15]]  }
  0x29   :  { %2347 = sst [smem:[#allocation18_spill]] %s2110_s27 }
  0x2a   :  { %s2130_s27 = sld [smem:[%s2327_s0 + %s1972_s22]]  }
  0x2c   :  { %2348 = sst [smem:[#allocation19_spill]] %s2115_s4 }
  0x2d   :  { %2349 = sst [smem:[#allocation20_spill]] %s2120_s8 }
  0x2e   :  { %s2135_s4 = sld [smem:[%s2327_s0 + %s1973_s28]]  }
  0x2f   :  { %s2140_s8 = sld [smem:[%s2327_s0 + %s1974_s7]]  }
  0x30   :  { %67 = vsyncpa [#allocation3], 0  ;;  %v2143_v0 = vld [vmem:[%s1990_s5] sm:$0xff]  ;;  %vm161_vm0 = vcmask 64512   ;;  %v134_v2 = vld [vmem:[%s1995_s9 + $0x8] sm:$0xff]  ;;  %v1975_v5 = vmov 0  }
  0x31   :  { %v133_v1 = vld [vmem:[%s1995_s9] sm:$0xff]  ;;  %1705 = vmatprep.subr.mxu1 %v2143_v0  ;;  %v135_v3 = vld [vmem:[%s1995_s9 + $0x10] sm:$0xff]  ;;  %v140_v4 = vld [vmem:[%s2000_s13 + $0x18] sm:$0xff]  ;;  %1881 = vset.pattern.permute.xlu0 %v1975_v5 }
  0x32   :  { %1707 = vmatprep.mubr.msk.f32.mxu1 %vm161_vm0, %v133_v1  ;;  %1706 = vmatpush3.msra.mxu1 %v2143_v0  ;;  %v138_v6 = vld [vmem:[%s2000_s13 + $0x8] sm:$0xff]  ;;  %v136_v7 = vld [vmem:[%s1995_s9 + $0x18] sm:$0xff]  ;;  %v139_v8 = vld [vmem:[%s2000_s13 + $0x10] sm:$0xff] }
  0x33   :  { %1708 = vmatmul.mubr.msk.f32.vlgmr.msra.gmra.mxu1 %vm161_vm0, %v134_v2  ;;  %158 = vperm.xlu0 %1881, %v140_v4  }
  0x34   :  { %1710 = vmatprep.mubr.msk.f32.mxu1 %vm161_vm0, %v135_v3  ;;  %1882 = vset.pattern.permute.xlu1 %v1975_v5 }
  0x35   :  { %148 = vperm.xlu1 %1882, %v138_v6  }
  0x36   :  { %68 = vsyncpa [#allocation5], 0  ;;  %v137_v9 = vld [vmem:[%s2000_s13] sm:$0xff]  ;;  %v270_v10 = vld [vmem:[%s2010_s21 + $0x18] sm:$0xff]  ;;  %vm291_vm1 = vcmask 261120   ;;  %s2350_s0 = sld [smem:[#allocation9_spill]] }
  0x37   :  { %1711 = vmatmul.mubr.msk.f32.gmra.mxu1 %vm161_vm0, %v136_v7  ;;  %153 = vperm.xlu0 %1881, %v139_v8   ;;  %v269_v11 = vld [vmem:[%s2010_s21 + $0x10] sm:$0xff]  ;;  %v268_v12 = vld [vmem:[%s2010_s21 + $0x8] sm:$0xff]  ;;  %v267_v13 = vld [vmem:[%s2010_s21] sm:$0xff]  ;;  %s2351_s5 = sld [smem:[#allocation10_spill]]  ;;  %vm1977_vm2 = vmmov 0  }
  0x38   :  { %v396_v14 = vld [vmem:[%s2020_s29 + $0x8] sm:$0xff]  ;;  %v395_v15 = vld [vmem:[%s2020_s29] sm:$0xff]  ;;  %v261_v34 = vld [vmem:[%s2005_s17 + $0x10] sm:$0xff]  ;;  %s2352_s9 = sld [smem:[#allocation14_spill]] }
  0x39   :  { %143 = vperm.xlu1 %1882, %v137_v9   ;;  %v259_v16 = vld [vmem:[%s2005_s17] sm:$0xff]  ;;  %v260_v33 = vld [vmem:[%s2005_s17 + $0x8] sm:$0xff]  ;;  %v262_v35 = vld [vmem:[%s2005_s17 + $0x18] sm:$0xff]  ;;  %s2353_s13 = sld [smem:[#allocation16_spill]] }
  0x3a   :  { %1721 = vmatprep.mubr.msk.f32.mxu1 %vm291_vm1, %v259_v16  ;;  %v389_v36 = vld [vmem:[%s2015_s25] sm:$0xff]  ;;  %v390_v53 = vld [vmem:[%s2015_s25 + $0x8] sm:$0xff]  ;;  %v538_v3 = vld [vmem:[%s2045_s24 + $0x18] sm:$0xff]  ;;  %s2354_s17 = sld [smem:[#allocation18_spill]] }
  0x3b   :  { %288 = vperm.xlu0 %1881, %v270_v10   ;;  %1735 = vmatprep.mubr.msk.f32.mxu0 %vm291_vm1, %v389_v36  ;;  %v505_v2 = vld [vmem:[%s2025_s3] sm:$0xff]  ;;  %v536_v4 = vld [vmem:[%s2045_s24 + $0x8] sm:$0xff]  ;;  %v667_v5 = vld [vmem:[%s2055_s6 + $0x18] sm:$0xff]  ;;  %s2355_s21 = sld [smem:[#allocation12_spill]] }
  0x3c   :  { %v665_v6 = vld [vmem:[%s2055_s6 + $0x8] sm:$0xff]  ;;  %v791_v16 = vld [vmem:[%s2065_s20] sm:$0xff]  ;;  %s2356_s25 = sld [smem:[#allocation20_spill]] }
  0x3d   :  { %283 = vperm.xlu1 %1882, %v269_v11   ;;  %v792_v7 = vld [vmem:[%s2065_s20 + $0x8] sm:$0xff]  ;;  %v513_v11 = vld [vmem:[%s2035_s14] sm:$0xff]  ;;  %s2357_s29 = sld [smem:[#allocation13_spill]] }
  0x3e   :  { %s2358_s3 = sld [smem:[#allocation8_spill]] }
  0x3f   :  { %278 = vperm.xlu0 %1881, %v268_v12   ;;  %v537_v12 = vld [vmem:[%s2045_s24 + $0x10] sm:$0xff]  ;;  %s2359_s14 = sld [smem:[#allocation11_spill]] }
  0x41   :  { %273 = vperm.xlu1 %1882, %v267_v13   ;;  %v535_v13 = vld [vmem:[%s2045_s24] sm:$0xff]  ;;  %s2361_s24 = sld [smem:[#allocation17_spill]] }
  0x43   :  { %404 = vperm.xlu0 %1881, %v396_v14   ;;  %v666_v14 = vld [vmem:[%s2055_s6 + $0x10] sm:$0xff] }
  0x45   :  { %399 = vperm.xlu1 %1882, %v395_v15   ;;  %v664_v15 = vld [vmem:[%s2055_s6] sm:$0xff]  ;;  %s1978_s6 = smov [#allocation4]  }
  0xae   :  { %v159_v17 = vpop.permute.xlu0 %158 }
  0xb0   :  { %v149_v19 = vpop.permute.xlu1 %148 }
  0xb2   :  { %v154_v23 = vpop.permute.xlu0 %153 }
  0xb4   :  { %v144_v28 = vpop.permute.xlu1 %143 }
  0xb6   :  { %v289_v37 = vpop.permute.xlu0 %288 }
  0xb8   :  { %v284_v39 = vpop.permute.xlu1 %283 }
  0xba   :  { %v279_v43 = vpop.permute.xlu0 %278 }
  0xbc   :  { %v274_v48 = vpop.permute.xlu1 %273 }
  0xbe   :  { %v405_v54 = vpop.permute.xlu0 %404 }
  0xc0   :  { %v400_v60 = vpop.permute.xlu1 %399 }
  0xf3   :  { %v1709_v18 = vpop.f32.mrf.mxu1 }
  0xf4   :  { %v246_v25 = vadd.f32 %v1709_v18, %v149_v19 }
  0xf5   :  { %v240_v20 = vpop.f32.mrf.mxu1 }
  0xf6   :  { %v241_v29 = vadd.f32 %v240_v20, %v144_v28  ;;  %v264_v31 = vmax.f32 %v246_v25, 0.0  ;;  %v533_v28 = vld [vmem:[%s2040_s19 + $0x10] sm:$0xff] }
  0xf7   :  { %v1712_v21 = vpop.f32.mrf.mxu1 }
  0xf8   :  { %v256_v22 = vadd.f32 %v1712_v21, %v159_v17  ;;  %v263_v32 = vmax.f32 %v241_v29, 0.0  ;;  %v531_v17 = vld [vmem:[%s2040_s19] sm:$0xff]  ;;  %v534_v29 = vld [vmem:[%s2040_s19 + $0x18] sm:$0xff] }
  0xf9   :  { %v250_v24 = vpop.f32.mrf.mxu1 }
  0xfa   :  { %v266_v26 = vmax.f32 %v256_v22, 0.0  ;;  %v251_v27 = vadd.f32 %v250_v24, %v154_v23 }
  0xfc   :  { %v265_v30 = vmax.f32 %v251_v27, 0.0  ;;  %1713 = vmatprep.subr.mxu1 %v266_v26  ;;  %v532_v27 = vld [vmem:[%s2040_s19 + $0x8] sm:$0xff]  ;;  %s2360_s19 = sld [smem:[#allocation15_spill]] }
  0xfd   :  { %1714 = vmatpush3.msra.mxu1 %v266_v26 }
  0xfe   :  { %1715 = vmatprep.subr.mxu1 %v265_v30 }
  0xff   :  { %1716 = vmatpush3.msra.mxu1 %v265_v30  ;;  %v656_v30 = vld [vmem:[%s2050_s30] sm:$0xff] }
 0x100   :  { %1717 = vmatprep.subr.mxu1 %v264_v31 }
 0x101   :  { %1718 = vmatpush3.msra.mxu1 %v264_v31 }
 0x102   :  { %1719 = vmatprep.subr.mxu1 %v263_v32 }
 0x103   :  { %1720 = vmatpush3.msra.mxu1 %v263_v32 }
 0x104   :  { %1722 = vmatmul.mubr.msk.f32.vlgmr.msra.gmra.mxu1 %vm291_vm1, %v260_v33 }
 0x105   :  { %1724 = vmatprep.mubr.msk.f32.mxu1 %vm291_vm1, %v261_v34 }
 0x108   :  { %1725 = vmatmul.mubr.msk.f32.gmra.mxu1 %vm291_vm1, %v262_v35 }
 0x109   :  { %1754 = vmatprep.mubr.msk.f32.mxu1 %vm291_vm1, %v656_v30 }
 0x1c4   :  { %v1723_v38 = vpop.f32.mrf.mxu1 }
 0x1c5   :  { %v376_v45 = vadd.f32 %v1723_v38, %v279_v43 }
 0x1c6   :  { %v370_v40 = vpop.f32.mrf.mxu1 }
 0x1c7   :  { %v371_v49 = vadd.f32 %v370_v40, %v274_v48  ;;  %v392_v51 = vmax.f32 %v376_v45, 0.0  ;;  %v658_v48 = vld [vmem:[%s2050_s30 + $0x10] sm:$0xff] }
 0x1c8   :  { %v1726_v41 = vpop.f32.mrf.mxu1 }
 0x1c9   :  { %v386_v42 = vadd.f32 %v1726_v41, %v289_v37  ;;  %v391_v52 = vmax.f32 %v371_v49, 0.0  ;;  %v659_v49 = vld [vmem:[%s2050_s30 + $0x18] sm:$0xff] }
 0x1ca   :  { %v380_v44 = vpop.f32.mrf.mxu1 }
 0x1cb   :  { %v394_v46 = vmax.f32 %v386_v42, 0.0  ;;  %v381_v47 = vadd.f32 %v380_v44, %v284_v39 }
 0x1cd   :  { %v393_v50 = vmax.f32 %v381_v47, 0.0  ;;  %1727 = vmatprep.subr.mxu0 %v394_v46  ;;  %v657_v47 = vld [vmem:[%s2050_s30 + $0x8] sm:$0xff]  ;;  %s2362_s30 = sld [smem:[#allocation19_spill]] }
 0x1ce   :  { %1728 = vmatpush3.msra.mxu0 %v394_v46 }
 0x1cf   :  { %1729 = vmatprep.subr.mxu0 %v393_v50 }
 0x1d0   :  { %1730 = vmatpush3.msra.mxu0 %v393_v50  ;;  %v785_v50 = vld [vmem:[%s2350_s0] sm:$0xff] }
 0x1d1   :  { %1731 = vmatprep.subr.mxu0 %v392_v51 }
 0x1d2   :  { %1732 = vmatpush3.msra.mxu0 %v392_v51 }
 0x1d3   :  { %1733 = vmatprep.subr.mxu0 %v391_v52 }
 0x1d4   :  { %1734 = vmatpush3.msra.mxu0 %v391_v52 }
 0x1d5   :  { %1736 = vmatmul.mubr.msk.f32.vlgmr.msra.gmra.mxu0 %vm291_vm1, %v390_v53 }
 0x1d6   :  { %1740 = vmatprep.mubr.msk.f32.mxu0 %vm161_vm0, %v531_v17  ;;  %v902_v17 = vld [vmem:[%s2351_s5] sm:$0xff] }
 0x295   :  { %v1737_v55 = vpop.f32.mrf.mxu0 }
 0x296   :  { %v2177_v56 = vadd.f32 %v1737_v55, %v405_v54 }
 0x297   :  { %v479_v59 = vpop.f32.mrf.mxu0 }
 0x298   :  { %v489_v57 = vsub.f32 0.0, %v2177_v56  ;;  %v480_v61 = vadd.f32 %v479_v59, %v400_v60 }
 0x29a   :  { %v490_v58 = vmul.f32 1.442695, %v489_v57  ;;  %v488_v62 = vsub.f32 %v2143_v0, %v480_v61 }
 0x29c   :  { %1883 = vpow2.f32 %v490_v58 }
 0x2a9   :  { %v1884_v63 = vpop.eup %1883 }
 0x2aa   :  { %v492_v1 = vmul.f32 %v1884_v63, %v488_v62 }
 0x2ac   :  { %494 = vadd.xlane.f32.xlu0 %v492_v1 }
 0x2c2   :  { %509 = vperm.xlu0 %1881, %v505_v2  }
 0x2c6   :  { %556 = vperm.xlu0 %1881, %v538_v3  }
 0x2ca   :  { %546 = vperm.xlu0 %1881, %v536_v4  }
 0x2ce   :  { %685 = vperm.xlu0 %1881, %v667_v5  }
 0x2d2   :  { %675 = vperm.xlu0 %1881, %v665_v6   ;;  %v786_v6 = vld [vmem:[%s2350_s0 + $0x8] sm:$0xff] }
 0x2d6   :  { %800 = vperm.xlu0 %1881, %v792_v7  }
 0x335   :  { %v495_v0 = vpop.xlane.xlu0 %494 }
 0x336   :  { %v496_v8 = vmul.f32 0.0078125, %v495_v0 }
 0x338   :  { %v497_v9 = vsub.f32 %v492_v1, %v496_v8 }
 0x33a   :  { %v499_v10 = vmul.f32 %v497_v9, %v497_v9 }
 0x33c   :  { %500 = vadd.xlane.f32.xlu1 %v499_v10 }
 0x33d   :  { %v510_v23 = vpop.permute.xlu0 %509 }
 0x341   :  { %v557_v31 = vpop.permute.xlu0 %556 }
 0x345   :  { %v547_v37 = vpop.permute.xlu0 %546 }
 0x349   :  { %v686_v51 = vpop.permute.xlu0 %685 }
 0x34d   :  { %516 = vperm.xlu1 %1882, %v513_v11   ;;  %v676_v59 = vpop.permute.xlu0 %675 }
 0x351   :  { %551 = vperm.xlu1 %1882, %v537_v12   ;;  %v801_v7 = vpop.permute.xlu0 %800 }
 0x355   :  { %541 = vperm.xlu1 %1882, %v535_v13  }
 0x359   :  { %680 = vperm.xlu1 %1882, %v666_v14  }
 0x35d   :  { %670 = vperm.xlu1 %1882, %v664_v15  }
 0x361   :  { %795 = vperm.xlu1 %1882, %v791_v16  }
 0x3c5   :  { %v501_v18 = vpop.xlane.xlu1 %500 }
 0x3c6   :  { %v502_v19 = vmul.f32 0.007874016, %v501_v18  ;;  %v935_v18 = vld [vmem:[%s2352_s9 + $0x18] sm:$0xff] }
 0x3c8   :  { %v2197_v20 = vadd.f32 1e-05, %v502_v19  ;;  %v933_v19 = vld [vmem:[%s2352_s9 + $0x8] sm:$0xff] }
 0x3c9   :  { %v517_v25 = vpop.permute.xlu1 %516 }
 0x3ca   :  { %1885 = vrsqrt.f32 %v2197_v20 }
 0x3cd   :  { %v552_v33 = vpop.permute.xlu1 %551 }
 0x3d1   :  { %v542_v42 = vpop.permute.xlu1 %541 }
 0x3d5   :  { %v681_v53 = vpop.permute.xlu1 %680 }
 0x3d7   :  { %v1886_v21 = vpop.eup %1885 }
 0x3d8   :  { %v506_v22 = vmul.f32 %v1886_v21, %v497_v9  ;;  %v1064_v21 = vld [vmem:[%s2353_s13 + $0x18] sm:$0xff] }
 0x3d9   :  { %v671_v1 = vpop.permute.xlu1 %670 }
 0x3da   :  { %v512_v24 = vmul.f32 %v510_v23, %v506_v22  ;;  %v1062_v22 = vld [vmem:[%s2353_s13 + $0x8] sm:$0xff] }
 0x3db   :  { %v1190_v23 = vld [vmem:[%s2354_s17 + $0x8] sm:$0xff] }
 0x3dc   :  { %v2200_v26 = vadd.f32 %v517_v25, %v512_v24  ;;  %v1422_v24 = vld [vmem:[%s2130_s27 + $0x8] sm:$0xff]  ;;  %v1189_v25 = vld [vmem:[%s2354_s17] sm:$0xff] }
 0x3dd   :  { %v796_v12 = vpop.permute.xlu1 %795 }
 0x3de   :  { %1738 = vmatprep.subr.mxu0 %v2200_v26 }
 0x3df   :  { %1739 = vmatpush3.msra.mxu0 %v2200_v26 }
 0x3e0   :  { %1741 = vmatmul.mubr.msk.f32.vlgmr.msra.gmra.mxu0 %vm161_vm0, %v532_v27 }
 0x3e1   :  { %1743 = vmatprep.mubr.msk.f32.mxu0 %vm161_vm0, %v533_v28 }
 0x3e4   :  { %1744 = vmatmul.mubr.msk.f32.gmra.mxu0 %vm161_vm0, %v534_v29 }
 0x3e5   :  { %1768 = vmatprep.mubr.msk.f32.mxu0 %vm291_vm1, %v785_v50 }
 0x4a0   :  { %v1742_v32 = vpop.f32.mrf.mxu0 }
 0x4a1   :  { %v643_v39 = vadd.f32 %v1742_v32, %v547_v37  ;;  %v934_v32 = vld [vmem:[%s2352_s9 + $0x10] sm:$0xff] }
 0x4a2   :  { %v637_v34 = vpop.f32.mrf.mxu0 }
 0x4a3   :  { %v638_v43 = vadd.f32 %v637_v34, %v542_v42  ;;  %v661_v45 = vmax.f32 %v643_v39, 0.0  ;;  %v1063_v34 = vld [vmem:[%s2353_s13 + $0x10] sm:$0xff]  ;;  %v1305_v42 = vld [vmem:[%s2356_s25] sm:$0xff] }
 0x4a4   :  { %v1745_v35 = vpop.f32.mrf.mxu0 }
 0x4a5   :  { %v653_v36 = vadd.f32 %v1745_v35, %v557_v31  ;;  %v660_v46 = vmax.f32 %v638_v43, 0.0  ;;  %v910_v31 = vld [vmem:[%s2355_s21] sm:$0xff] }
 0x4a6   :  { %v647_v38 = vpop.f32.mrf.mxu0 }
 0x4a7   :  { %v663_v40 = vmax.f32 %v653_v36, 0.0  ;;  %v648_v41 = vadd.f32 %v647_v38, %v552_v33  ;;  %v932_v33 = vld [vmem:[%s2352_s9] sm:$0xff]  ;;  %v1306_v38 = vld [vmem:[%s2356_s25 + $0x8] sm:$0xff] }
 0x4a8   :  { %v1061_v36 = vld [vmem:[%s2353_s13] sm:$0xff] }
 0x4a9   :  { %v662_v44 = vmax.f32 %v648_v41, 0.0  ;;  %1746 = vmatprep.subr.mxu1 %v663_v40  ;;  %v520_v41 = vld [vmem:[%s2358_s3] sm:$0xff] }
 0x4aa   :  { %1747 = vmatpush3.msra.mxu1 %v663_v40  ;;  %v928_v40 = vld [vmem:[%s2357_s29] sm:$0xff] }
 0x4ab   :  { %1748 = vmatprep.subr.mxu1 %v662_v44 }
 0x4ac   :  { %1749 = vmatpush3.msra.mxu1 %v662_v44 }
 0x4ad   :  { %1750 = vmatprep.subr.mxu1 %v661_v45 }
 0x4ae   :  { %1751 = vmatpush3.msra.mxu1 %v661_v45 }
 0x4af   :  { %1752 = vmatprep.subr.mxu1 %v660_v46 }
 0x4b0   :  { %1753 = vmatpush3.msra.mxu1 %v660_v46 }
 0x4b1   :  { %1755 = vmatmul.mubr.msk.f32.vlgmr.msra.gmra.mxu1 %vm291_vm1, %v657_v47 }
 0x4b2   :  { %1757 = vmatprep.mubr.msk.f32.mxu1 %vm291_vm1, %v658_v48 }
 0x4b5   :  { %1758 = vmatmul.mubr.msk.f32.gmra.mxu1 %vm291_vm1, %v659_v49 }
 0x571   :  { %v1756_v52 = vpop.f32.mrf.mxu1 }
 0x572   :  { %v772_v61 = vadd.f32 %v1756_v52, %v676_v59  ;;  %v917_v52 = vld [vmem:[%s2359_s14] sm:$0xff]  ;;  %v929_v59 = vld [vmem:[%s2357_s29 + $0x8] sm:$0xff] }
 0x573   :  { %v766_v54 = vpop.f32.mrf.mxu1 }
 0x574   :  { %v767_v2 = vadd.f32 %v766_v54, %v671_v1  ;;  %v788_v4 = vmax.f32 %v772_v61, 0.0  ;;  %v931_v61 = vld [vmem:[%s2357_s29 + $0x18] sm:$0xff] }
 0x575   :  { %v1759_v55 = vpop.f32.mrf.mxu1 }
 0x576   :  { %v782_v58 = vadd.f32 %v1759_v55, %v686_v51  ;;  %v787_v5 = vmax.f32 %v767_v2, 0.0 }
 0x577   :  { %v776_v60 = vpop.f32.mrf.mxu1 }
 0x578   :  { %v790_v62 = vmax.f32 %v782_v58, 0.0  ;;  %v777_v63 = vadd.f32 %v776_v60, %v681_v53  ;;  %v930_v60 = vld [vmem:[%s2357_s29 + $0x10] sm:$0xff] }
 0x57a   :  { %v789_v3 = vmax.f32 %v777_v63, 0.0  ;;  %1760 = vmatprep.subr.mxu0 %v790_v62 }
 0x57b   :  { %1761 = vmatpush3.msra.mxu0 %v790_v62  ;;  %v1053_v62 = vld [vmem:[%s2360_s19] sm:$0xff] }
 0x57c   :  { %1762 = vmatprep.subr.mxu0 %v789_v3 }
 0x57d   :  { %1763 = vmatpush3.msra.mxu0 %v789_v3 }
 0x57e   :  { %1764 = vmatprep.subr.mxu0 %v788_v4 }
 0x57f   :  { %1765 = vmatpush3.msra.mxu0 %v788_v4 }
 0x580   :  { %1766 = vmatprep.subr.mxu0 %v787_v5 }
 0x581   :  { %1767 = vmatpush3.msra.mxu0 %v787_v5 }
 0x582   :  { %1769 = vmatmul.mubr.msk.f32.vlgmr.msra.gmra.mxu0 %vm291_vm1, %v786_v6 }
 0x583   :  { %1773 = vmatprep.mubr.msk.f32.mxu0 %vm161_vm0, %v928_v40  ;;  %v1187_v40 = vld [vmem:[%s2361_s24 + $0x8] sm:$0xff] }
 0x642   :  { %v1770_v0 = vpop.f32.mrf.mxu0 }
 0x643   :  { %v2222_v8 = vadd.f32 %v1770_v0, %v801_v7 }
 0x644   :  { %v875_v11 = vpop.f32.mrf.mxu0 }
 0x645   :  { %v885_v9 = vsub.f32 0.0, %v2222_v8  ;;  %v876_v13 = vadd.f32 %v875_v11, %v796_v12 }
 0x647   :  { %v886_v10 = vmul.f32 1.442695, %v885_v9  ;;  %v884_v14 = vsub.f32 %v2200_v26, %v876_v13  ;;  %v1421_v26 = vld [vmem:[%s2130_s27] sm:$0xff] }
 0x649   :  { %1887 = vpow2.f32 %v886_v10 }
 0x64a   :  { %1889 = vlog2.f32 %v2197_v20 }
 0x656   :  { %v1888_v15 = vpop.eup %1887 }
 0x657   :  { %v888_v16 = vmul.f32 %v1888_v15, %v884_v14  ;;  %v1890_v35 = vpop.eup %1889 }
 0x658   :  { %v522_v37 = vmul.f32 0.6931472, %v1890_v35 }
 0x659   :  { %891 = vadd.xlane.f32.xlu0 %v888_v16 }
 0x65a   :  { %v523_v39 = vmul.f32 0.5, %v522_v37  ;;  %v1186_v37 = vld [vmem:[%s2361_s24] sm:$0xff] }
 0x65c   :  { %v524_v20 = vsub.f32 %v520_v41, %v523_v39  ;;  %v1303_v39 = vld [vmem:[%s2362_s30 + $0x8] sm:$0xff]  ;;  %v1304_v41 = vld [vmem:[%s2362_s30 + $0x10] sm:$0xff] }
 0x66f   :  { %906 = vperm.xlu0 %1881, %v902_v17   ;;  %v1055_v17 = vld [vmem:[%s2360_s19 + $0x10] sm:$0xff] }
 0x673   :  { %953 = vperm.xlu0 %1881, %v935_v18   ;;  %v1056_v18 = vld [vmem:[%s2360_s19 + $0x18] sm:$0xff] }
 0x677   :  { %943 = vperm.xlu0 %1881, %v933_v19   ;;  %v1976_v19 = vmov 0.0  }
 0x678   :  { %1793 = vmatprep.subr.mxu1 %v1976_v19  ;;  %1801 = vmatprep.mubr.msk.f32.mxu1 %vm1977_vm2, %v1976_v19 }
 0x67b   :  { %1082 = vperm.xlu0 %1881, %v1064_v21  }
 0x67f   :  { %1072 = vperm.xlu0 %1881, %v1062_v22  }
 0x683   :  { %1199 = vperm.xlu0 %1881, %v1190_v23  }
 0x687   :  { %1431 = vperm.xlu0 %1881, %v1422_v24  }
 0x68b   :  { %1194 = vperm.xlu0 %1881, %v1189_v25  }
 0x68f   :  { %1426 = vperm.xlu0 %1881, %v1421_v26  }
 0x6e2   :  { %v892_v27 = vpop.xlane.xlu0 %891 }
 0x6e3   :  { %v893_v28 = vmul.f32 0.0078125, %v892_v27 }
 0x6e5   :  { %v894_v29 = vsub.f32 %v888_v16, %v893_v28  ;;  %v1054_v16 = vld [vmem:[%s2360_s19 + $0x8] sm:$0xff] }
 0x6e7   :  { %v896_v30 = vmul.f32 %v894_v29, %v894_v29 }
 0x6e9   :  { %897 = vadd.xlane.f32.xlu1 %v896_v30 }
 0x6ea   :  { %v907_v49 = vpop.permute.xlu0 %906 }
 0x6ee   :  { %v954_v63 = vpop.permute.xlu0 %953 }
 0x6f2   :  { %v944_v6 = vpop.permute.xlu0 %943 }
 0x6f6   :  { %v1083_v21 = vpop.permute.xlu0 %1082 }
 0x6fa   :  { %913 = vperm.xlu1 %1882, %v910_v31   ;;  %v1073_v27 = vpop.permute.xlu0 %1072 }
 0x6fe   :  { %948 = vperm.xlu1 %1882, %v934_v32  }
 0x702   :  { %938 = vperm.xlu1 %1882, %v932_v33  }
 0x706   :  { %1077 = vperm.xlu1 %1882, %v1063_v34  }
 0x70a   :  { %1067 = vperm.xlu1 %1882, %v1061_v36  }
 0x70e   :  { %1315 = vperm.xlu1 %1882, %v1306_v38   ;;  %v1302_v38 = vld [vmem:[%s2362_s30] sm:$0xff] }
 0x712   :  { %527 = vperm.xlu1 %1882, %v524_v20   ;;  %v1188_v20 = vld [vmem:[%s2361_s24 + $0x10] sm:$0xff] }
 0x716   :  { %1310 = vperm.xlu1 %1882, %v1305_v42   ;;  %v1418_v42 = vld [vmem:[%s2125_s12] sm:$0xff] }
 0x772   :  { %v898_v43 = vpop.xlane.xlu1 %897 }
 0x773   :  { %v899_v44 = vmul.f32 0.007874016, %v898_v43  ;;  %v1419_v43 = vld [vmem:[%s2125_s12 + $0x8] sm:$0xff] }
 0x775   :  { %v900_v45 = vadd.f32 1e-05, %v899_v44  ;;  %v1420_v44 = vld [vmem:[%s2125_s12 + $0x10] sm:$0xff]  ;;  %s1551_s12 = sshll.u32 %s1978_s6, 4  ;;  %s1552_s12 = int_to_ptr.vmem [resolvable:$true] %s1551_s12 }
 0x776   :  { %v914_v53 = vpop.permute.xlu1 %913  ;;  %s1901_s20 = scalar_lea.vmem %s1552_s12, 384  ;;  %p1906_p1 = scmp.lt.s32.totalorder %s1552_s12, %s1552_s12 }
 0x777   :  { %1891 = vrsqrt.f32 %v900_v45  ;;  %p1902_p0 = scmp.ne.s32.totalorder %s1552_s12, %s1901_s20  ;;  %p1907_p2 = scmp.lt.s32.totalorder %s1901_s20, %s1901_s20 }
 0x778   :  { %1893 = vlog2.f32 %v900_v45 }
 0x779   :  { %p1908_p3 = por %p1907_p2, %p1906_p1 }
 0x77a   :  { %v949_v2 = vpop.permute.xlu1 %948 }
 0x77b   :  { %p1909_p4 = pnand %p1908_p3, %p1902_p0 }
 0x77e   :  { %v939_v11 = vpop.permute.xlu1 %938 }
 0x782   :  { %v1078_v23 = vpop.permute.xlu1 %1077 }
 0x784   :  { %v1892_v46 = vpop.eup %1891 }
 0x785   :  { %v1894_v47 = vpop.eup %1893  ;;  %v903_v48 = vmul.f32 %v1892_v46, %v894_v29 }
 0x786   :  { %v919_v50 = vmul.f32 0.6931472, %v1894_v47  ;;  %v1068_v32 = vpop.permute.xlu1 %1067 }
 0x787   :  { %v909_v51 = vmul.f32 %v907_v49, %v903_v48 }
 0x788   :  { %v920_v54 = vmul.f32 0.5, %v919_v50 }
 0x789   :  { %v2247_v55 = vadd.f32 %v914_v53, %v909_v51 }
 0x78a   :  { %v921_v58 = vsub.f32 %v917_v52, %v920_v54  ;;  %v1316_v45 = vpop.permute.xlu1 %1315 }
 0x78b   :  { %1771 = vmatprep.subr.mxu0 %v2247_v55 }
 0x78c   :  { %924 = vperm.xlu1 %1882, %v921_v58   ;;  %1772 = vmatpush3.msra.mxu0 %v2247_v55 }
 0x78d   :  { %1774 = vmatmul.mubr.msk.f32.vlgmr.msra.gmra.mxu0 %vm161_vm0, %v929_v59  ;;  %v1200_v59 = vpop.permute.xlu0 %1199 }
 0x78e   :  { %1776 = vmatprep.mubr.msk.f32.mxu0 %vm161_vm0, %v930_v60  ;;  %v528_v46 = vpop.permute.xlu1 %527 }
 0x78f   :  { %v530_v48 = vadd.f32 %v528_v46, %v489_v57 }
 0x791   :  { %1777 = vmatmul.mubr.msk.f32.gmra.mxu0 %vm161_vm0, %v931_v61  ;;  %v889_v54 = vsub.f32 %v530_v48, %v2222_v8 }
 0x792   :  { %1787 = vmatprep.mubr.msk.f32.mxu0 %vm291_vm1, %v1053_v62  ;;  %v1311_v47 = vpop.permute.xlu1 %1310 }
 0x807   :  { %v925_v51 = vpop.permute.xlu1 %924 }
 0x808   :  { %v927_v60 = vadd.f32 %v925_v51, %v889_v54 }
 0x84d   :  { %v1775_v1 = vpop.f32.mrf.mxu0 }
 0x84e   :  { %v1040_v0 = vadd.f32 %v1775_v1, %v944_v6 }
 0x84f   :  { %v1034_v3 = vpop.f32.mrf.mxu0 }
 0x850   :  { %v1035_v12 = vadd.f32 %v1034_v3, %v939_v11  ;;  %v1058_v14 = vmax.f32 %v1040_v0, 0.0 }
 0x851   :  { %v1778_v4 = vpop.f32.mrf.mxu0 }
 0x852   :  { %v1050_v5 = vadd.f32 %v1778_v4, %v954_v63  ;;  %v1057_v15 = vmax.f32 %v1035_v12, 0.0 }
 0x853   :  { %v1044_v7 = vpop.f32.mrf.mxu0 }
 0x854   :  { %v1060_v9 = vmax.f32 %v1050_v5, 0.0  ;;  %v1045_v10 = vadd.f32 %v1044_v7, %v949_v2 }
 0x856   :  { %v1059_v13 = vmax.f32 %v1045_v10, 0.0  ;;  %1779 = vmatprep.subr.mxu0 %v1060_v9  ;;  %v1432_v10 = vpop.permute.xlu0 %1431 }
 0x857   :  { %1780 = vmatpush3.msra.mxu0 %v1060_v9 }
 0x858   :  { %1781 = vmatprep.subr.mxu0 %v1059_v13 }
 0x859   :  { %1782 = vmatpush3.msra.mxu0 %v1059_v13 }
 0x85a   :  { %1783 = vmatprep.subr.mxu0 %v1058_v14 }
 0x85b   :  { %1784 = vmatpush3.msra.mxu0 %v1058_v14 }
 0x85c   :  { %1785 = vmatprep.subr.mxu0 %v1057_v15 }
 0x85d   :  { %1786 = vmatpush3.msra.mxu0 %v1057_v15  ;;  %v1195_v15 = vpop.permute.xlu0 %1194 }
 0x85e   :  { %1788 = vmatmul.mubr.msk.f32.vlgmr.msra.gmra.mxu0 %vm291_vm1, %v1054_v16  ;;  %1810 = vmatprep.subr.mxu0 %v1976_v19 }
 0x85f   :  { %1790 = vmatprep.mubr.msk.f32.mxu0 %vm291_vm1, %v1055_v17 }
 0x862   :  { %1791 = vmatmul.mubr.msk.f32.gmra.mxu0 %vm291_vm1, %v1056_v18 }
 0x863   :  { %1818 = vmatprep.mubr.msk.f32.mxu0 %vm1977_vm2, %v1976_v19 }
 0x91e   :  { %v1789_v22 = vpop.f32.mrf.mxu0 }
 0x91f   :  { %v1169_v29 = vadd.f32 %v1789_v22, %v1073_v27 }
 0x920   :  { %v1163_v24 = vpop.f32.mrf.mxu0 }
 0x921   :  { %v1164_v33 = vadd.f32 %v1163_v24, %v1068_v32  ;;  %v1183_v35 = vmax.f32 %v1169_v29, 0.0 }
 0x922   :  { %v1792_v25 = vpop.f32.mrf.mxu0 }
 0x923   :  { %v1179_v26 = vadd.f32 %v1792_v25, %v1083_v21  ;;  %v1182_v36 = vmax.f32 %v1164_v33, 0.0 }
 0x924   :  { %v1173_v28 = vpop.f32.mrf.mxu0 }
 0x925   :  { %v1185_v30 = vmax.f32 %v1179_v26, 0.0  ;;  %v1174_v31 = vadd.f32 %v1173_v28, %v1078_v23 }
 0x927   :  { %v1184_v34 = vmax.f32 %v1174_v31, 0.0  ;;  %1794 = vmatpush3.msra.mxu1 %v1185_v30  ;;  %1811 = vmatpush3.msra.mxu0 %v1185_v30 }
 0x928   :  { %1795 = vmatprep.subr.mxu1 %v1976_v19  ;;  %1812 = vmatprep.subr.mxu0 %v1976_v19 }
 0x929   :  { %1796 = vmatpush3.msra.mxu1 %v1184_v34  ;;  %1813 = vmatpush3.msra.mxu0 %v1184_v34 }
 0x92a   :  { %1797 = vmatprep.subr.mxu1 %v1976_v19  ;;  %1814 = vmatprep.subr.mxu0 %v1976_v19 }
 0x92b   :  { %1798 = vmatpush3.msra.mxu1 %v1183_v35  ;;  %1815 = vmatpush3.msra.mxu0 %v1183_v35 }
 0x92c   :  { %1799 = vmatprep.subr.mxu1 %v1976_v19  ;;  %1816 = vmatprep.subr.mxu0 %v1976_v19 }
 0x92d   :  { %1800 = vmatpush3.msra.mxu1 %v1182_v36  ;;  %1817 = vmatpush3.msra.mxu0 %v1182_v36 }
 0x92e   :  { %1802 = vmatmul.mubr.msk.f32.vlgmr.msra.gmra.mxu1 %vm291_vm1, %v1186_v37  ;;  %1819 = vmatmul.mubr.msk.f32.vlgmr.msra.gmra.mxu0 %vm291_vm1, %v1302_v38 }
 0x92f   :  { %1827 = vmatprep.subr.mxu1 %v1976_v19  ;;  %1804 = vmatprep.mubr.msk.f32.mxu1 %vm1977_vm2, %v1976_v19 }
 0x930   :  { %1828 = vmatpush3.msra.mxu1 %v1185_v30  ;;  %1821 = vmatprep.mubr.msk.f32.mxu0 %vm1977_vm2, %v1976_v19 }
 0x931   :  { %1829 = vmatprep.subr.mxu1 %v1976_v19 }
 0x932   :  { %1830 = vmatpush3.msra.mxu1 %v1184_v34  ;;  %1822 = vmatmul.mubr.msk.f32.gmra.mxu0 %vm291_vm1, %v1303_v39 }
 0x933   :  { %1805 = vmatmul.mubr.msk.f32.gmra.mxu1 %vm291_vm1, %v1187_v40  ;;  %1831 = vmatprep.subr.mxu1 %v1976_v19 }
 0x934   :  { %1832 = vmatpush3.msra.mxu1 %v1183_v35  ;;  %1807 = vmatprep.mubr.msk.f32.mxu1 %vm1977_vm2, %v1976_v19 }
 0x935   :  { %1833 = vmatprep.subr.mxu1 %v1976_v19  ;;  %1824 = vmatprep.mubr.msk.f32.mxu0 %vm1977_vm2, %v1976_v19 }
 0x936   :  { %1834 = vmatpush3.msra.mxu1 %v1182_v36  ;;  %1825 = vmatmul.mubr.msk.f32.gmra.mxu0 %vm291_vm1, %v1304_v41 }
 0x937   :  { %1808 = vmatmul.mubr.msk.f32.gmra.mxu1 %vm291_vm1, %v1188_v20 }
 0x938   :  { %1835 = vmatprep.mubr.msk.f32.mxu1 %vm1977_vm2, %v1976_v19 }
 0x93b   :  { %1836 = vmatmul.mubr.msk.f32.vlgmr.msra.gmra.mxu1 %vm291_vm1, %v1418_v42 }
 0x93c   :  { %1838 = vmatprep.mubr.msk.f32.mxu1 %vm1977_vm2, %v1976_v19 }
 0x93f   :  { %1839 = vmatmul.mubr.msk.f32.gmra.mxu1 %vm291_vm1, %v1419_v43 }
 0x940   :  { %1841 = vmatprep.mubr.msk.f32.mxu1 %vm1977_vm2, %v1976_v19 }
 0x943   :  { %1842 = vmatmul.mubr.msk.f32.gmra.mxu1 %vm291_vm1, %v1420_v44 }
 0x9ee   :  { %v1281_v49 = vpop.f32.mrf.mxu1  ;;  %v1397_v50 = vpop.f32.mrf.mxu0 }
 0x9ef   :  { %v1398_v16 = vadd.f32 %v1397_v50, %v1311_v47  ;;  %v1282_v18 = vadd.f32 %v1281_v49, %v1195_v15 }
 0x9f0   :  { %v1803_v52 = vpop.f32.mrf.mxu1  ;;  %v1820_v53 = vpop.f32.mrf.mxu0 }
 0x9f1   :  { %v1410_v24 = vsub.f32 %v2247_v55, %v1398_v16 }
 0x9f2   :  { %v1402_v58 = vpop.f32.mrf.mxu0 }
 0x9f3   :  { %v1286_v61 = vpop.f32.mrf.mxu1  ;;  %v1403_v62 = vadd.f32 %v1402_v58, %v1316_v45 }
 0x9f4   :  { %v1287_v63 = vadd.f32 %v1286_v61, %v1200_v59  ;;  %v1823_v1 = vpop.f32.mrf.mxu0 }
 0x9f5   :  { %v1411_v2 = vsub.f32 0.0, %v1403_v62  ;;  %v1416_v3 = vsub.f32 %v927_v60, %v1403_v62  ;;  %v1806_v4 = vpop.f32.mrf.mxu1 }
 0x9f6   :  { %v1295_v5 = vsub.f32 0.0, %v1287_v63  ;;  %v1300_v56 = vsub.f32 %v927_v60, %v1287_v63  ;;  %v1407_v57 = vpop.f32.mrf.mxu0 }
 0x9f7   :  { %v1412_v6 = vmul.f32 1.442695, %v1411_v2  ;;  %1417 = vst [vmem:[#allocation4 + $0x8] sm:$0xff] %v1416_v3  ;;  %v1291_v7 = vpop.f32.mrf.mxu1 }
 0x9f8   :  { %v1296_v0 = vmul.f32 1.442695, %v1295_v5  ;;  %1301 = vst [vmem:[#allocation4] sm:$0xff] %v1300_v56  ;;  %v1826_v9 = vpop.f32.mrf.mxu0 }
 0x9f9   :  { %1895 = vpow2.f32 %v1412_v6  ;;  %v1809_v8 = vpop.f32.mrf.mxu1 }
 0x9fa   :  { %1897 = vpow2.f32 %v1296_v0 }
 0x9fb   :  { %v1513_v11 = vpop.f32.mrf.mxu1 }
 0x9fd   :  { %v1837_v12 = vpop.f32.mrf.mxu1 }
 0x9ff   :  { %v1518_v13 = vpop.f32.mrf.mxu1 }
 0xa00   :  { %v1519_v14 = vadd.f32 %v1518_v13, %v1432_v10 }
 0xa01   :  { %v1840_v17 = vpop.f32.mrf.mxu1 }
 0xa02   :  { %v1527_v19 = vsub.f32 0.0, %v1519_v14  ;;  %v1532_v21 = vsub.f32 %v927_v60, %v1519_v14 }
 0xa03   :  { %v1523_v22 = vpop.f32.mrf.mxu1 }
 0xa04   :  { %v1528_v23 = vmul.f32 1.442695, %v1527_v19  ;;  %1533 = vst [vmem:[#allocation4 + $0x10] sm:$0xff] %v1532_v21 }
 0xa05   :  { %v1843_v25 = vpop.f32.mrf.mxu1 }
 0xa06   :  { %1912 = shalt.err (!%p1909_p4)
}
 0xa07   :  { %s1979_s27 = smov 128   ;;  %s1980_s15 = smov 8   ;;  %v1896_v26 = vpop.eup %1895  ;;  %v1294_v27 = vsub.f32 %v2247_v55, %v1282_v18  ;;  %1899 = vpow2.f32 %v1528_v23  ;;  %v1427_v31 = vpop.permute.xlu0 %1426 }
 0xa08   :  { %1557 = dma.vmem_to_hbm [thread:$0]  %s1552_s12, 384, %s2140_s8, [#allocation5], %s1979_s27, %s1979_s27, %s1980_s15   ;;  %v1898_v28 = vpop.eup %1897  ;;  %v1414_v29 = vmul.f32 %v1896_v26, %v1410_v24  ;;  %v1514_v32 = vadd.f32 %v1513_v11, %v1427_v31 }
 0xa09   :  { %v1298_v30 = vmul.f32 %v1898_v28, %v1294_v27  ;;  %s1981_s16 = smov [#allocation2]  }
 0xa0a   :  { %1415 = vst [vmem:[#allocation2 + $0x8] sm:$0xff] %v1414_v29  ;;  %s1539_s18 = sshll.u32 %s1981_s16, 4  ;;  %v1526_v33 = vsub.f32 %v2247_v55, %v1514_v32  ;;  %s1540_s18 = int_to_ptr.vmem [resolvable:$true] %s1539_s18 }
 0xa0b   :  { %1299 = vst [vmem:[#allocation2] sm:$0xff] %v1298_v30  ;;  %s1921_s8 = scalar_lea.vmem %s1540_s18, 384  ;;  %p1926_p6 = scmp.lt.s32.totalorder %s1540_s18, %s1540_s18 }
 0xa0c   :  { %p1922_p5 = scmp.ne.s32.totalorder %s1540_s18, %s1921_s8  ;;  %p1927_p7 = scmp.lt.s32.totalorder %s1921_s8, %s1921_s8 }
 0xa0e   :  { %p1928_p8 = por %p1927_p7, %p1926_p6 }
 0xa10   :  { %p1929_p9 = pnand %p1928_p8, %p1922_p5 }
 0xa14   :  { %v1900_v34 = vpop.eup %1899 }
 0xa15   :  { %v1530_v35 = vmul.f32 %v1900_v34, %v1526_v33 }
 0xa17   :  { %1531 = vst [vmem:[#allocation2 + $0x10] sm:$0xff] %v1530_v35 }
 0xa18   :  { %1932 = shalt.err (!%p1929_p9)
}
 0xa19   :  { %1545 = dma.vmem_to_hbm [thread:$0]  %s1540_s18, 384, %s2135_s4, [#allocation3], %s1979_s27, %s1979_s27, %s1980_s15  }
 0xa1a   :  { %1941 = dma.done.wait [#allocation3], 384  }
 0xa1b   :  { %1942 = vsyncadd [#allocation3], 4294966912 }
 0xa1c   :  { %1943 = dma.done.wait [#allocation5], 384  }
 0xa1d   :  { %1944 = vsyncadd [#allocation5], 4294966912 }
 0xa1e   :  { %1564 = vsyncpa [#allocation3], 1 }
 0xa1f   :  { %1565 = vsyncpa [#allocation5], 1 }

</bundles_post_ra>
